<compile_context>
chip_gen: v6e
topology: v6e:2x2x1
jax: 0.10.0
libtpu: 0.0.40
codegen_flags: <defaults>
</compile_context>

<pallas_src>
import jax
import jax.numpy as jnp
from jax.experimental import pallas as pl
from jax.experimental.pallas import tpu as pltpu


def _linear_kernel(w_ref, b_ref, x_ref, o_ref):
    # w_ref: (1,) f32 in SMEM   -- W[0, 0]
    # b_ref: (1,) f32 in SMEM   -- b[0]
    # x_ref: (B, 1) f32 in VMEM
    # o_ref: (B, 1) f32 in VMEM
    o_ref[...] = x_ref[...] * w_ref[0] + b_ref[0]


def pallas_linear(x, weight, bias):
    """y = x @ weight.T + bias for nn.Linear(1, 1), as a VPU scale-and-add."""
    B, K = x.shape
    N, K2 = weight.shape
    assert K == K2 == 1 and N == 1, "This kernel specializes Linear(1, 1)."

    w_s = weight.reshape((1,)).astype(jnp.float32)   # scalar weight -> SMEM
    b_s = bias.reshape((1,)).astype(jnp.float32)     # scalar bias   -> SMEM

    return pl.pallas_call(
        _linear_kernel,
        out_shape=jax.ShapeDtypeStruct((B, N), jnp.float32),
        in_specs=[
            pl.BlockSpec(memory_space=pltpu.MemorySpace.SMEM),   # weight scalar
            pl.BlockSpec(memory_space=pltpu.MemorySpace.SMEM),   # bias scalar
            pl.BlockSpec(memory_space=pltpu.MemorySpace.VMEM),   # x, whole array
        ],
        out_specs=pl.BlockSpec(memory_space=pltpu.MemorySpace.VMEM),
    )(w_s, b_s, x.astype(jnp.float32))


if __name__ == "__main__":
    key = jax.random.PRNGKey(0)
    k_w, k_b, k_x = jax.random.split(key, 3)

    in_features, out_features = 1, 1
    batch = 2

    # Deterministic parameter init (Linear(1, 1): weight (1,1), bias (1,)).
    weight = jax.random.uniform(
        k_w, (out_features, in_features), jnp.float32, minval=-1.0, maxval=1.0
    )
    bias = jax.random.uniform(
        k_b, (out_features,), jnp.float32, minval=-1.0, maxval=1.0
    )

    # Example input consistent with the module (reference uses x = [[1.]]).
    x = jax.random.normal(k_x, (batch, in_features), jnp.float32)

    y = pallas_linear(x, weight, bias)
    jax.block_until_ready(y)

    # Reference check in plain JAX.
    y_ref = x @ weight.T + bias
    assert y.shape == (batch, out_features)
    assert jnp.allclose(y, y_ref, atol=1e-5, rtol=1e-5)

    # Also verify the exact spec input x = [[1.]].
    x_spec = jnp.array([[1.0]], jnp.float32)
    y_spec = pallas_linear(x_spec, weight, bias)
    jax.block_until_ready(y_spec)
    assert jnp.allclose(y_spec, x_spec @ weight.T + bias, atol=1e-5, rtol=1e-5)

    print("KERNEL_OK")
</pallas_src>

<mosaic_0001>
module attributes {stable_mosaic.version = 11 : i64} {
  func.func @_linear_kernel(%arg0: memref<1xf32, #tpu.memory_space<smem>>, %arg1: memref<1xf32, #tpu.memory_space<smem>>, %arg2: memref<2x1xf32, #tpu.memory_space<vmem>>, %arg3: memref<2x1xf32, #tpu.memory_space<vmem>>) attributes {dimension_semantics = [], scalar_prefetch = 0 : i64, scratch_operands = 0 : i64, tpu.core_type = #tpu.core_type<tc>} {
    %c0 = arith.constant 0 : index
    %c0_0 = arith.constant 0 : index
    %0 = vector.load %arg2[%c0, %c0_0] : memref<2x1xf32, #tpu.memory_space<vmem>>, vector<2x1xf32>
    %c0_1 = arith.constant 0 : index
    %1 = memref.load %arg0[%c0_1] : memref<1xf32, #tpu.memory_space<smem>>
    %2 = vector.broadcast %1 : f32 to vector<2x1xf32>
    %3 = arith.mulf %0, %2 : vector<2x1xf32>
    %c0_2 = arith.constant 0 : index
    %4 = memref.load %arg1[%c0_2] : memref<1xf32, #tpu.memory_space<smem>>
    %5 = vector.broadcast %4 : f32 to vector<2x1xf32>
    %6 = arith.addf %3, %5 : vector<2x1xf32>
    %c0_3 = arith.constant 0 : index
    %c0_4 = arith.constant 0 : index
    %7 = vector.load %arg3[%c0_3, %c0_4] : memref<2x1xf32, #tpu.memory_space<vmem>>, vector<2x1xf32>
    tpu.vector_store %arg3[%c0_3, %c0_4], %6 {strides = array<i32>} : memref<2x1xf32, #tpu.memory_space<vmem>>, vector<2x1xf32>,
    return
  }
}

</mosaic_0001>

<bundles_post_ra>
// kernel: tpu_custom_call.1
= control target key start
LH: loop header
LB: loop body
LE: loop exit
PB: predicated region body
PF: predicated region fallthrough
CT: control target
= control target key end

     0   :  { %vm23_vm0 = vcmask 1024   ;;  %s61_s0 = inlined_call_operand.<no memory space> [shape: f32[1], index: 0, kind: input, shape index: {}]   ;;  %s62_s1 = inlined_call_operand.<no memory space> [shape: f32[1], index: 1, kind: input, shape index: {}]   ;;  %s63_s2 = inlined_call_operand.vmem [shape: f32[2,1], index: 2, kind: input, shape index: {}]   ;;  %s64_s3 = inlined_call_operand.vmem [shape: f32[2,1], index: 3, kind: output, shape index: {}]  }
   0x1   :  { %v16_v0 = vld [vmem:[%s63_s2] sm:$0x3]  ;;  %v18_v1 = vstv %s61_s0  ;;  %v21_v2 = vstv %s62_s1 }
   0x2   :  { %v19_v3 = vmul.f32 %v18_v1, %v16_v0 }
   0x4   :  { %v22_v4 = vadd.f32 %v21_v2, %v19_v3 }
   0x6   :  { %24 = vst.msk [vmem:[%s64_s3] sm:$0x3] %vm23_vm0, %v22_v4 }

</bundles_post_ra>
